<compile_context>
chip_gen: v7x
topology: tpu7x:2x2x1
jax: 0.10.0
libtpu: 0.0.40
codegen_flags: <defaults>
</compile_context>

<pallas_src>
import jax
import jax.numpy as jnp
from jax.experimental import pallas as pl
from jax.experimental.pallas import tpu as pltpu

LANES = 128
# Double-buffered (input + output) streaming-buffer VMEM budget.
TOTAL_BUFFER_BYTES = 24 * 1024 * 1024   # ~6 MiB per f32 block, 4 buffers total
VMEM_LIMIT_BYTES = 40 * 1024 * 1024     # buffers + headroom; <= v7x 64 MiB physical


def _round_up(a: int, b: int) -> int:
    return (a + b - 1) // b * b


def _elementwise_kernel(x_ref, o_ref):
    """y = (((x + 2) - 1) * 3 / 4.0) ** 2, same op order as the PyTorch module."""
    x = x_ref[...]
    if jnp.issubdtype(x.dtype, jnp.floating):
        y4 = (((x + 2.0) - 1.0) * 3.0) / 4.0
    else:
        # Integer inputs: torch does add/sub/mul in integer arithmetic and only
        # promotes to float for the division. Sub-32-bit ints are widened to
        # int32 for robust lowering on the VPU.
        xi = x.astype(jnp.int32)
        y4 = (((xi + 2) - 1) * 3).astype(o_ref.dtype) / 4.0
    o_ref[...] = (y4 * y4).astype(o_ref.dtype)


def _run_2d(x2d, out_dtype, rows, row_block, allow_fusion):
    grid = (pl.cdiv(rows, row_block),)
    return pl.pallas_call(
        _elementwise_kernel,
        out_shape=jax.ShapeDtypeStruct((rows, LANES), out_dtype),
        grid_spec=pltpu.PrefetchScalarGridSpec(
            num_scalar_prefetch=0,
            grid=grid,
            in_specs=[pl.BlockSpec((row_block, LANES), lambda i: (i, 0))],
            out_specs=pl.BlockSpec((row_block, LANES), lambda i: (i, 0)),
        ),
        compiler_params=pltpu.CompilerParams(
            dimension_semantics=("parallel",),
            vmem_limit_bytes=VMEM_LIMIT_BYTES,
            allow_input_fusion=[True] if allow_fusion else None,
        ),
    )(x2d)


def pt_module_forward(x: jax.Array) -> jax.Array:
    """Elementwise (((x + 2) - 1) * 3 / 4.0) ** 2 via a Pallas TPU kernel."""
    orig_shape = x.shape
    n = x.size

    # dtype handling (all decisions are static, on the abstract dtype).
    if jnp.issubdtype(x.dtype, jnp.floating):
        if x.dtype == jnp.float64:        # TPU has no native f64
            x = x.astype(jnp.float32)
        out_dtype = x.dtype
    else:
        # torch: int_tensor / 4.0 -> float32. Keep the (narrow) integer input
        # dtype through the BlockSpec; convert inside the kernel.
        if x.dtype == jnp.bool_ or x.dtype == jnp.int64 or x.dtype == jnp.uint64:
            x = x.astype(jnp.int32)
        out_dtype = jnp.float32

    if n == 0:
        return jnp.zeros(orig_shape, out_dtype)

    in_item = jnp.dtype(x.dtype).itemsize
    out_item = jnp.dtype(out_dtype).itemsize
    # Native sublane multiple for the narrowest dtype touched
    # (8 for 4-byte, 16 for 2-byte, 32 for 1-byte).
    sub = max(8, 32 // min(in_item, out_item))

    rows = -(-n // LANES)

    # Block rows from the VMEM budget (input + output, double buffered each).
    blk = TOTAL_BUFFER_BYTES // (2 * LANES * (in_item + out_item))
    blk = max(sub, blk // sub * sub)
    if rows >= 2 * sub:
        # Keep at least 2 grid steps so a megacore chip (v7x) can shard them.
        half = _round_up(-(-rows // 2), sub)
        row_block = min(blk, half)
    else:
        row_block = min(blk, _round_up(rows, sub))

    pad = rows * LANES - n
    x_flat = x.reshape(-1)
    if pad:
        # Rare misaligned tail: < 128 elements of padding; allow_input_fusion
        # lets XLA fuse this pad into the pallas_call operand.
        x_flat = jnp.pad(x_flat, (0, pad))
    x2d = x_flat.reshape(rows, LANES)

    out2d = _run_2d(x2d, out_dtype, rows, row_block, allow_fusion=bool(pad))

    if pad:
        return out2d.reshape(-1)[:n].reshape(orig_shape)
    return out2d.reshape(orig_shape)


# Jit the wrapper so the (free) reshapes and any rare pad/slice fuse with the
# surrounding program.
pt_module_forward_jit = jax.jit(pt_module_forward)


def _reference(x):
    return (((x + 2.0) - 1.0) * 3.0 / 4.0) ** 2


if __name__ == "__main__":
    key = jax.random.PRNGKey(0)
    # Small NCHW-like input consistent with the module's forward: (2, 4, 16, 16)
    x = jax.random.normal(key, (2, 4, 16, 16), dtype=jnp.float32)

    y = jax.block_until_ready(pt_module_forward_jit(x))

    y_ref = _reference(x)
    assert y.shape == x.shape and y.dtype == x.dtype
    assert jnp.allclose(y, y_ref, atol=1e-6, rtol=1e-6)
    print("KERNEL_OK")
</pallas_src>

<mosaic_0001>
module attributes {stable_mosaic.version = 11 : i64} {
  func.func @_elementwise_kernel(%arg0: i32, %arg1: memref<8x128xf32, #tpu.memory_space<vmem>>, %arg2: memref<8x128xf32, #tpu.memory_space<vmem>>) attributes {dimension_semantics = [#tpu.dimension_semantics<parallel>], iteration_bounds = array<i64: 2>, scalar_prefetch = 0 : i64, scratch_operands = 0 : i64, tpu.core_type = #tpu.core_type<tc>, window_params = [{transform_indices = @transform_0, window_bounds = array<i64: 8, 128>}, {transform_indices = @transform_1, window_bounds = array<i64: 8, 128>}]} {
    %c0 = arith.constant 0 : index
    %c0_0 = arith.constant 0 : index
    %0 = vector.load %arg1[%c0, %c0_0] : memref<8x128xf32, #tpu.memory_space<vmem>>, vector<8x128xf32>
    %cst = arith.constant 2.000000e+00 : f32
    %1 = vector.broadcast %cst : f32 to vector<8x128xf32>
    %2 = arith.addf %0, %1 : vector<8x128xf32>
    %cst_1 = arith.constant 1.000000e+00 : f32
    %3 = vector.broadcast %cst_1 : f32 to vector<8x128xf32>
    %4 = arith.subf %2, %3 : vector<8x128xf32>
    %cst_2 = arith.constant 3.000000e+00 : f32
    %5 = vector.broadcast %cst_2 : f32 to vector<8x128xf32>
    %6 = arith.mulf %4, %5 : vector<8x128xf32>
    %cst_3 = arith.constant 4.000000e+00 : f32
    %7 = vector.broadcast %cst_3 : f32 to vector<8x128xf32>
    %8 = arith.divf %6, %7 : vector<8x128xf32>
    %9 = arith.mulf %8, %8 : vector<8x128xf32>
    %c0_4 = arith.constant 0 : index
    %c0_5 = arith.constant 0 : index
    %10 = vector.load %arg2[%c0_4, %c0_5] : memref<8x128xf32, #tpu.memory_space<vmem>>, vector<8x128xf32>
    tpu.vector_store %arg2[%c0_4, %c0_5], %9 {strides = array<i32>} : memref<8x128xf32, #tpu.memory_space<vmem>>, vector<8x128xf32>,
    return
  }
  func.func @transform_0(%arg0: i32) -> (i32, i32) {
    %c0_i32 = arith.constant 0 : i32
    %c0_i32_0 = arith.constant 0 : i32
    return %arg0, %c0_i32 : i32, i32
  }
  func.func @transform_1(%arg0: i32) -> (i32, i32) {
    %c0_i32 = arith.constant 0 : i32
    %c0_i32_0 = arith.constant 0 : i32
    return %arg0, %c0_i32 : i32, i32
  }
}

</mosaic_0001>

<bundles_post_ra>
// kernel: pt_module_forward.1
= control target key start
LH: loop header
LB: loop body
LE: loop exit
PB: predicated region body
PF: predicated region fallthrough
CT: control target
= control target key end

     0   :  { %s195_s6 = smov 0   ;;  %s215_s0 = inlined_call_operand.vmem [shape: f32[16,128], index: 0, kind: input, shape index: {}]   ;;  %s216_s1 = inlined_call_operand.vmem [shape: f32[16,128], index: 1, kind: output, shape index: {}]  }
   0x1 LB: > { %s173_s7 = sadd.s32 4294967295, %s197_s6   ;;  %p177_p0 = scmp.ge.s32.totalorder %s197_s6, 1  ;;  %s197_s6 = sphi %s195_s6, %s11_s6  }
   0x2   : > { %p86_p1 = scmp.lt.s32.totalorder %s197_s6, 3 }
   0x4   : > { %p87_p2 = pnand %p177_p0, %p86_p1 }
   0x5   : > { %p104_p3 = scmp.lt.s32.totalorder (!%p87_p2), %s173_s7, 1 }
   0x6   : > { %90 = sbr.rel (%p87_p2) target bundleno = 28 (0x1c), region = 24 }
   0xd   : > { %s218_s7 = smov (!%p104_p3, %s173_s7), 1 }
   0xe   : > { %s178_s8 = sshll.u32 %s218_s7, 3 }
   0xf   : > { %s107_s11 = scalar_lea.vmem %s215_s0, %s178_s8  ;;  %s111_s14 = scalar_lea.vmem %s216_s1, %s178_s8 }
  0x10   : > { %v112_v0 = vld [vmem:[%s107_s11] sm:$0xff] }
  0x11   : > { %v113_v1 = vadd.f32 2.0, %v112_v0 }
  0x13   : > { %v180_v2 = vadd.f32 -1.0, %v113_v1 }
  0x15   : > { %v115_v3 = vmul.f32 3.0, %v180_v2 }
  0x17   : > { %v117_v4 = vmul.f32 0.25, %v115_v3 }
  0x19   : > { %v118_v5 = vmul.f32 %v117_v4, %v117_v4 }
  0x1b   : > { %119 = vst [vmem:[%s111_s14] sm:$0xff] %v118_v5 }
  0x1c PF: > { %s11_s6 = sadd.s32 1, %s197_s6  }
  0x1d   : > { %p8_p4 = scmp.ge.s32.totalorder %s11_s6, 4  }
  0x1f   :  { %10 = sbr.rel (!%p8_p4) target bundleno = 1 (0x1), region = 54 }

</bundles_post_ra>
